<compile_context>
chip_gen: v5e
topology: v5e:2x2
jax: 0.10.0
libtpu: 0.0.40
codegen_flags: <defaults>
</compile_context>

<pallas_src>
import functools

import jax
import jax.numpy as jnp
from jax.experimental import pallas as pl
from jax.experimental.pallas import tpu as pltpu


def _ce_update(s, hit, m_ref, l_ref, c_ref, in_vocab=None):
    """One online-logsumexp step over a (tm, tv) logits tile.

    in_vocab=None -> full ("fast") tile, no padding mask work at all.
    in_vocab      -> (1, tv) bool lane mask for the partial last vocab tile.
    """
    m_prev = m_ref[...]
    if in_vocab is None:
        tile_max = jnp.max(s, axis=-1, keepdims=True)
        m_new = jnp.maximum(m_prev, tile_max)
        p = jnp.exp(s - m_new)
    else:
        s_m = jnp.where(in_vocab, s, -jnp.inf)
        tile_max = jnp.max(s_m, axis=-1, keepdims=True)
        m_new = jnp.maximum(m_prev, tile_max)
        # Guard keeps exp(-inf - -inf) = NaN out of the running sum.
        p = jnp.where(in_vocab, jnp.exp(s_m - m_new), 0.0)
    alpha = jnp.exp(m_prev - m_new)
    l_ref[...] = alpha * l_ref[...] + jnp.sum(p, axis=-1, keepdims=True)
    m_ref[...] = m_new
    # Gather the logit at the label position (label == -1 / out-of-range never hits).
    c_ref[...] += jnp.sum(jnp.where(hit, s, 0.0), axis=-1, keepdims=True)


def _ce_kernel(logits_ref, labels_ref, loss_ref, m_ref, l_ref, c_ref, *, vocab_size):
    """Online-softmax cross entropy with ignore_index == -1.

    logits_ref: (tm, tv)  current vocab tile of the logits (input dtype, upcast here)
    labels_ref: (tm, 1)   int32 labels (-1 == ignore)
    loss_ref:   (tm, 1)   per-row loss (0 for ignored rows), written on last tile
    m_ref/l_ref/c_ref: (tm, 1) f32 scratch: running max, running sum(exp), label logit
    """
    k = pl.program_id(1)
    nk = pl.num_programs(1)
    tv = logits_ref.shape[1]

    @pl.when(k == 0)
    def _():
        m_ref[...] = jnp.full(m_ref.shape, -jnp.inf, jnp.float32)
        l_ref[...] = jnp.zeros(l_ref.shape, jnp.float32)
        c_ref[...] = jnp.zeros(c_ref.shape, jnp.float32)

    s = logits_ref[...].astype(jnp.float32)                   # (tm, tv)
    labels = labels_ref[...]                                  # (tm, 1) int32
    lane = jax.lax.broadcasted_iota(jnp.int32, (1, tv), 1)    # (1, tv) lane iota only
    hit = lane == (labels - k * tv)                           # (tm, tv) via broadcast

    if vocab_size % tv != 0:
        # Only the final vocab tile can be partial: keep the mask off the hot path.
        @pl.when(k < nk - 1)
        def _():
            _ce_update(s, hit, m_ref, l_ref, c_ref)

        @pl.when(k == nk - 1)
        def _():
            in_vocab = lane < (vocab_size - k * tv)           # (1, tv)
            _ce_update(s, hit, m_ref, l_ref, c_ref, in_vocab=in_vocab)
    else:
        _ce_update(s, hit, m_ref, l_ref, c_ref)

    @pl.when(k == nk - 1)
    def _():
        lse = m_ref[...] + jnp.log(l_ref[...])
        per_row = lse - c_ref[...]
        loss_ref[...] = jnp.where(labels == -1, 0.0, per_row).astype(loss_ref.dtype)


def _pick_tiles(M, V, itemsize):
    """Per-generation tile / VMEM-limit selection."""
    try:
        vmem_cap = int(getattr(pltpu.get_tpu_info(), "vmem_capacity_bytes",
                               128 * 1024 * 1024))
    except Exception:
        vmem_cap = 128 * 1024 * 1024
    small_vmem = vmem_cap <= 80 * 1024 * 1024              # v7x-class: 64 MiB / TC
    tile_budget = (4 if small_vmem else 8) * 1024 * 1024   # bytes per logits buffer

    tm = min(256, M)
    # v7x has 2 TensorCores sharing the "parallel" row axis: keep >= 2 row tiles.
    if small_vmem and tm == M and M >= 16:
        tm = max(8, (((M + 1) // 2) + 7) // 8 * 8)

    tv = min(V, 8192, max(128, tile_budget // max(1, tm * itemsize)))
    if tv < V:
        tv = max(128, (tv // 128) * 128)   # lane-dense, 128-aligned vocab tile
    else:
        tv = V

    # Scoped VMEM: double-buffered logits tiles + full-tile temporaries + headroom,
    # never the whole physical VMEM (the old 64 MiB request == all of v7x's VMEM).
    vmem_limit = int(min(vmem_cap - 16 * 1024 * 1024,
                         max(32 * 1024 * 1024, 8 * tm * tv * itemsize)))
    return tm, tv, vmem_limit


def _cross_entropy_mean_ignore_neg1(logits2d, labels1d):
    """Mean CE over rows with label != -1 (torch CrossEntropyLoss(ignore_index=-1))."""
    M, V = logits2d.shape
    tm, tv, vmem_limit = _pick_tiles(M, V, jnp.dtype(logits2d.dtype).itemsize)
    labels2d = labels1d.astype(jnp.int32).reshape(M, 1)

    per_row = pl.pallas_call(
        functools.partial(_ce_kernel, vocab_size=V),
        out_shape=jax.ShapeDtypeStruct((M, 1), jnp.float32),
        grid_spec=pltpu.PrefetchScalarGridSpec(
            num_scalar_prefetch=0,
            grid=(pl.cdiv(M, tm), pl.cdiv(V, tv)),
            in_specs=[
                pl.BlockSpec((tm, tv), lambda i, k: (i, k)),  # logits tile, read once
                pl.BlockSpec((tm, 1), lambda i, k: (i, 0)),   # labels, row-resident
            ],
            out_specs=pl.BlockSpec((tm, 1), lambda i, k: (i, 0)),
            scratch_shapes=[
                pltpu.VMEM((tm, 1), jnp.float32),   # running max
                pltpu.VMEM((tm, 1), jnp.float32),   # running sum(exp)
                pltpu.VMEM((tm, 1), jnp.float32),   # logit at label
            ],
        ),
        compiler_params=pltpu.CompilerParams(
            dimension_semantics=("parallel", "arbitrary"),
            vmem_limit_bytes=vmem_limit,
        ),
    )(logits2d, labels2d)

    total = jnp.sum(per_row)
    n_valid = jnp.sum((labels1d != -1).astype(jnp.float32))
    return total / n_valid


def _ce_mean_ignore_neg1_small(logits, labels):
    """Plain-JAX CE for the tiny NSP head ((B, 2) logits): XLA fuses this trivially."""
    logits = logits.astype(jnp.float32)
    labels = labels.astype(jnp.int32)
    valid = labels != -1
    lse = jax.scipy.special.logsumexp(logits, axis=-1)
    picked = jnp.take_along_axis(logits, jnp.where(valid, labels, 0)[:, None], axis=-1)[:, 0]
    per = jnp.where(valid, lse - picked, 0.0)
    return jnp.sum(per) / jnp.sum(valid.astype(jnp.float32))


@functools.partial(jax.jit, static_argnames=("vocab_size",))
def bert_pretraining_criterion(prediction_scores, seq_relationship_score,
                               masked_lm_labels, next_sentence_labels, *, vocab_size):
    """total_loss = CE(prediction_scores, mlm_labels, ignore=-1)
                  + CE(seq_relationship_score, nsp_labels, ignore=-1)."""
    # TODO(synk): skipping the ~85% of rows with label == -1 inside this op
    # (sequence_output_is_dense=True semantics) needs a dynamic row compaction /
    # static max_predictions budget; with an upstream-compacted dense sequence
    # output the same kernel is simply called on the smaller (num_masked, V) logits.
    mlm_logits = prediction_scores.reshape(-1, vocab_size)   # keep input dtype (bf16 ok)
    mlm_labels = masked_lm_labels.reshape(-1)
    masked_lm_loss = _cross_entropy_mean_ignore_neg1(mlm_logits, mlm_labels)

    next_sentence_loss = _ce_mean_ignore_neg1_small(
        seq_relationship_score.reshape(-1, 2), next_sentence_labels.reshape(-1))

    return masked_lm_loss + next_sentence_loss


if __name__ == "__main__":
    key = jax.random.PRNGKey(0)
    k1, k2, k3, k4 = jax.random.split(key, 4)

    batch, seq, vocab = 2, 8, 512
    prediction_scores = jax.random.normal(k1, (batch, seq, vocab), jnp.float32)
    seq_relationship_score = jax.random.normal(k2, (batch, 2), jnp.float32)

    # MLM labels: mostly -1 (ignored), a few real token ids, like BERT MLM.
    masked_lm_labels = jax.random.randint(k3, (batch, seq), 0, vocab)
    keep = jax.random.uniform(k4, (batch, seq)) < 0.25
    masked_lm_labels = jnp.where(keep, masked_lm_labels, -1)
    masked_lm_labels = masked_lm_labels.at[0, 0].set(7)   # ensure >= 1 valid label
    next_sentence_labels = jnp.array([0, 1], dtype=jnp.int32)

    # Pure-JAX reference (same math as torch.nn.CrossEntropyLoss(ignore_index=-1)).
    def ce_ref(logits, labels):
        logits = logits.astype(jnp.float32)
        valid = labels != -1
        lse = jax.scipy.special.logsumexp(logits, axis=-1)
        safe = jnp.where(valid, labels, 0)
        picked = jnp.take_along_axis(logits, safe[:, None], axis=-1)[:, 0]
        per = jnp.where(valid, lse - picked, 0.0)
        return jnp.sum(per) / jnp.sum(valid)

    # f32 logits path
    loss = bert_pretraining_criterion(
        prediction_scores, seq_relationship_score,
        masked_lm_labels, next_sentence_labels, vocab_size=vocab)
    loss = jax.block_until_ready(loss)
    ref = (ce_ref(prediction_scores.reshape(-1, vocab), masked_lm_labels.reshape(-1))
           + ce_ref(seq_relationship_score.reshape(-1, 2),
                    next_sentence_labels.reshape(-1)))
    assert loss.shape == ()
    assert jnp.allclose(loss, ref, atol=1e-5, rtol=1e-5), (loss, ref)

    # bf16 logits path (the HBM-bound case: stream bf16, upcast in VMEM)
    ps_bf16 = prediction_scores.astype(jnp.bfloat16)
    loss_bf16 = bert_pretraining_criterion(
        ps_bf16, seq_relationship_score,
        masked_lm_labels, next_sentence_labels, vocab_size=vocab)
    loss_bf16 = jax.block_until_ready(loss_bf16)
    ref_bf16 = (ce_ref(ps_bf16.reshape(-1, vocab), masked_lm_labels.reshape(-1))
                + ce_ref(seq_relationship_score.reshape(-1, 2),
                         next_sentence_labels.reshape(-1)))
    assert jnp.allclose(loss_bf16, ref_bf16, atol=2e-3, rtol=2e-3), (loss_bf16, ref_bf16)

    print("KERNEL_OK")
</pallas_src>

<mosaic_0001>
module attributes {stable_mosaic.version = 11 : i64} {
  func.func @_ce_kernel(%arg0: i32, %arg1: i32, %arg2: memref<16x512xf32, #tpu.memory_space<vmem>>, %arg3: memref<16x1xi32, #tpu.memory_space<vmem>>, %arg4: memref<16x1xf32, #tpu.memory_space<vmem>>, %arg5: memref<16x1xf32, #tpu.memory_space<vmem>>, %arg6: memref<16x1xf32, #tpu.memory_space<vmem>>, %arg7: memref<16x1xf32, #tpu.memory_space<vmem>>) attributes {dimension_semantics = [#tpu.dimension_semantics<parallel>, #tpu.dimension_semantics<arbitrary>], iteration_bounds = array<i64: 1, 1>, scalar_prefetch = 0 : i64, scratch_operands = 3 : i64, tpu.core_type = #tpu.core_type<tc>, window_params = [{transform_indices = @transform_0, window_bounds = array<i64: 16, 512>}, {transform_indices = @transform_1, window_bounds = array<i64: 16, 1>}, {transform_indices = @transform_2, window_bounds = array<i64: 16, 1>}]} {
    %c0_i32 = arith.constant 0 : i32
    %0 = arith.cmpi eq, %arg1, %c0_i32 : i32
    %1 = arith.extui %0 : i1 to i32
    %c0_i32_0 = arith.constant 0 : i32
    %2 = arith.cmpi ne, %1, %c0_i32_0 : i32
    scf.if %2 {
      %cst_21 = arith.constant 0xFF800000 : f32
      %38 = vector.broadcast %cst_21 : f32 to vector<16x1xf32>
      %c0_22 = arith.constant 0 : index
      %c0_23 = arith.constant 0 : index
      %39 = vector.load %arg5[%c0_22, %c0_23] : memref<16x1xf32, #tpu.memory_space<vmem>>, vector<16x1xf32>
      tpu.vector_store %arg5[%c0_22, %c0_23], %38 {strides = array<i32>} : memref<16x1xf32, #tpu.memory_space<vmem>>, vector<16x1xf32>,
      %cst_24 = arith.constant 0.000000e+00 : f32
      %40 = vector.broadcast %cst_24 : f32 to vector<16x1xf32>
      %c0_25 = arith.constant 0 : index
      %c0_26 = arith.constant 0 : index
      %41 = vector.load %arg6[%c0_25, %c0_26] : memref<16x1xf32, #tpu.memory_space<vmem>>, vector<16x1xf32>
      tpu.vector_store %arg6[%c0_25, %c0_26], %40 {strides = array<i32>} : memref<16x1xf32, #tpu.memory_space<vmem>>, vector<16x1xf32>,
      %cst_27 = arith.constant 0.000000e+00 : f32
      %42 = vector.broadcast %cst_27 : f32 to vector<16x1xf32>
      %c0_28 = arith.constant 0 : index
      %c0_29 = arith.constant 0 : index
      %43 = vector.load %arg7[%c0_28, %c0_29] : memref<16x1xf32, #tpu.memory_space<vmem>>, vector<16x1xf32>
      tpu.vector_store %arg7[%c0_28, %c0_29], %42 {strides = array<i32>} : memref<16x1xf32, #tpu.memory_space<vmem>>, vector<16x1xf32>,
    } else {
    }
    %c0 = arith.constant 0 : index
    %c0_1 = arith.constant 0 : index
    %3 = vector.load %arg2[%c0, %c0_1] : memref<16x512xf32, #tpu.memory_space<vmem>>, vector<16x512xf32>
    %c0_2 = arith.constant 0 : index
    %c0_3 = arith.constant 0 : index
    %4 = vector.load %arg3[%c0_2, %c0_3] : memref<16x1xi32, #tpu.memory_space<vmem>>, vector<16x1xi32>
    %5 = tpu.iota {dimensions = array<i32: 1>} : vector<1x512xi32>
    %c512_i32 = arith.constant 512 : i32
    %6 = arith.muli %arg1, %c512_i32 : i32
    %7 = vector.broadcast %6 : i32 to vector<16x1xi32>
    %8 = arith.subi %4, %7 : vector<16x1xi32>
    %9 = vector.broadcast %5 : vector<1x512xi32> to vector<16x512xi32>
    %10 = vector.broadcast %8 : vector<16x1xi32> to vector<16x512xi32>
    %11 = arith.cmpi eq, %9, %10 : vector<16x512xi32>
    %c0_4 = arith.constant 0 : index
    %c0_5 = arith.constant 0 : index
    %12 = vector.load %arg5[%c0_4, %c0_5] : memref<16x1xf32, #tpu.memory_space<vmem>>, vector<16x1xf32>
    %cst = arith.constant dense<0xFF800000> : vector<16xf32>
    %13 = vector.multi_reduction <maximumf>, %3, %cst [1] : vector<16x512xf32> to vector<16xf32>
    %14 = vector.shape_cast %13 : vector<16xf32> to vector<16x1xf32>
    %15 = arith.maximumf %12, %14 : vector<16x1xf32>
    %16 = vector.broadcast %15 : vector<16x1xf32> to vector<16x512xf32>
    %17 = arith.subf %3, %16 : vector<16x512xf32>
    %18 = math.exp %17 : vector<16x512xf32>
    %19 = arith.subf %12, %15 : vector<16x1xf32>
    %20 = math.exp %19 : vector<16x1xf32>
    %c0_6 = arith.constant 0 : index
    %c0_7 = arith.constant 0 : index
    %21 = vector.load %arg6[%c0_6, %c0_7] : memref<16x1xf32, #tpu.memory_space<vmem>>, vector<16x1xf32>
    %22 = arith.mulf %20, %21 : vector<16x1xf32>
    %cst_8 = arith.constant dense<0.000000e+00> : vector<16xf32>
    %23 = vector.multi_reduction <add>, %18, %cst_8 [1] : vector<16x512xf32> to vector<16xf32>
    %24 = vector.shape_cast %23 : vector<16xf32> to vector<16x1xf32>
    %25 = arith.addf %22, %24 : vector<16x1xf32>
    %c0_9 = arith.constant 0 : index
    %c0_10 = arith.constant 0 : index
    %26 = vector.load %arg6[%c0_9, %c0_10] : memref<16x1xf32, #tpu.memory_space<vmem>>, vector<16x1xf32>
    tpu.vector_store %arg6[%c0_9, %c0_10], %25 {strides = array<i32>} : memref<16x1xf32, #tpu.memory_space<vmem>>, vector<16x1xf32>,
    %c0_11 = arith.constant 0 : index
    %c0_12 = arith.constant 0 : index
    %27 = vector.load %arg5[%c0_11, %c0_12] : memref<16x1xf32, #tpu.memory_space<vmem>>, vector<16x1xf32>
    tpu.vector_store %arg5[%c0_11, %c0_12], %15 {strides = array<i32>} : memref<16x1xf32, #tpu.memory_space<vmem>>, vector<16x1xf32>,
    %c0_13 = arith.constant 0 : index
    %c0_14 = arith.constant 0 : index
    %28 = vector.load %arg7[%c0_13, %c0_14] : memref<16x1xf32, #tpu.memory_space<vmem>>, vector<16x1xf32>
    %cst_15 = arith.constant 0.000000e+00 : f32
    %29 = vector.broadcast %cst_15 : f32 to vector<16x512xf32>
    %30 = arith.select %11, %3, %29 : vector<16x512xi1>, vector<16x512xf32>
    %cst_16 = arith.constant dense<0.000000e+00> : vector<16xf32>
    %31 = vector.multi_reduction <add>, %30, %cst_16 [1] : vector<16x512xf32> to vector<16xf32>
    %32 = vector.shape_cast %31 : vector<16xf32> to vector<16x1xf32>
    %33 = arith.addf %28, %32 : vector<16x1xf32>
    %c0_17 = arith.constant 0 : index
    %c0_18 = arith.constant 0 : index
    %34 = vector.load %arg7[%c0_17, %c0_18] : memref<16x1xf32, #tpu.memory_space<vmem>>, vector<16x1xf32>
    tpu.vector_store %arg7[%c0_17, %c0_18], %33 {strides = array<i32>} : memref<16x1xf32, #tpu.memory_space<vmem>>, vector<16x1xf32>,
    %c0_i32_19 = arith.constant 0 : i32
    %35 = arith.cmpi eq, %arg1, %c0_i32_19 : i32
    %36 = arith.extui %35 : i1 to i32
    %c0_i32_20 = arith.constant 0 : i32
    %37 = arith.cmpi ne, %36, %c0_i32_20 : i32
    scf.if %37 {
      %c0_21 = arith.constant 0 : index
      %c0_22 = arith.constant 0 : index
      %38 = vector.load %arg5[%c0_21, %c0_22] : memref<16x1xf32, #tpu.memory_space<vmem>>, vector<16x1xf32>
      %c0_23 = arith.constant 0 : index
      %c0_24 = arith.constant 0 : index
      %39 = vector.load %arg6[%c0_23, %c0_24] : memref<16x1xf32, #tpu.memory_space<vmem>>, vector<16x1xf32>
      %40 = math.log %39 : vector<16x1xf32>
      %41 = arith.addf %38, %40 : vector<16x1xf32>
      %c0_25 = arith.constant 0 : index
      %c0_26 = arith.constant 0 : index
      %42 = vector.load %arg7[%c0_25, %c0_26] : memref<16x1xf32, #tpu.memory_space<vmem>>, vector<16x1xf32>
      %43 = arith.subf %41, %42 : vector<16x1xf32>
      %c-1_i32 = arith.constant -1 : i32
      %44 = vector.broadcast %c-1_i32 : i32 to vector<16x1xi32>
      %45 = arith.cmpi eq, %4, %44 : vector<16x1xi32>
      %cst_27 = arith.constant 0.000000e+00 : f32
      %46 = vector.broadcast %cst_27 : f32 to vector<16x1xf32>
      %47 = arith.select %45, %46, %43 : vector<16x1xi1>, vector<16x1xf32>
      %c0_28 = arith.constant 0 : index
      %c0_29 = arith.constant 0 : index
      %48 = vector.load %arg4[%c0_28, %c0_29] : memref<16x1xf32, #tpu.memory_space<vmem>>, vector<16x1xf32>
      tpu.vector_store %arg4[%c0_28, %c0_29], %47 {strides = array<i32>} : memref<16x1xf32, #tpu.memory_space<vmem>>, vector<16x1xf32>,
    } else {
    }
    return
  }
  func.func @transform_0(%arg0: i32, %arg1: i32) -> (i32, i32) {
    %c0_i32 = arith.constant 0 : i32
    return %arg0, %arg1 : i32, i32
  }
  func.func @transform_1(%arg0: i32, %arg1: i32) -> (i32, i32) {
    %c0_i32 = arith.constant 0 : i32
    %c0_i32_0 = arith.constant 0 : i32
    return %arg0, %c0_i32 : i32, i32
  }
  func.func @transform_2(%arg0: i32, %arg1: i32) -> (i32, i32) {
    %c0_i32 = arith.constant 0 : i32
    %c0_i32_0 = arith.constant 0 : i32
    return %arg0, %c0_i32 : i32, i32
  }
}

</mosaic_0001>

<bundles_post_ra>
// kernel: bert_pretraining_criterion.1
= control target key start
LH: loop header
LB: loop body
LE: loop exit
PB: predicated region body
PF: predicated region fallthrough
CT: control target
= control target key end

     0   :  { %7 = vsyncpa [#allocation6], 0  ;;  %s257_s12 = smov [#allocation5]   ;;  %s258_s14 = smov 512   ;;  %s379_s0 = inlined_call_operand.hbm [shape: f32[16,512], index: 0, kind: input, shape index: {}]   ;;  %s380_s1 = inlined_call_operand.vmem [shape: s32[16,1], index: 1, kind: input, shape index: {}]   ;;  %s381_s2 = inlined_call_operand.vmem [shape: f32[16,1], index: 2, kind: output, shape index: {}]  }
   0x1   :  { %s12_s11 = sshll.u32 %s379_s0, 4  ;;  %s14_s13 = sshll.u32 %s257_s12, 4  ;;  %s13_s11 = int_to_ptr.hbm [resolvable:$true] %s12_s11  ;;  %s15_s13 = int_to_ptr.vmem [resolvable:$true] %s14_s13 }
   0x2   :  { %s259_s15 = smov 32  }
   0x3   :  { %20 = dma.hbm_to_vmem [thread:$0]  %s13_s11, 1024, %s15_s13, [#allocation6], %s258_s14, %s258_s14, %s259_s15  }
   0x4   :  { %255 = dma.done.wait [#allocation6], 1024  }
   0x5   :  { %256 = vsyncadd [#allocation6], 4294966272  ;;  %vm31_vm0 = vcmask 7168   ;;  %v260_v0 = vmov -inf   ;;  %v283_v1 = vld [vmem:[#allocation5] sm:$0xff]  ;;  %v285_v2 = vld [vmem:[#allocation5 + $0x8] sm:$0xff]  ;;  %v48_v27 = vlaneseq }
   0x6   :  { %32 = vst.msk [vmem:[#allocation2] sm:$0xff] %vm31_vm0, %v260_v0  ;;  %v287_v3 = vld [vmem:[#allocation5 + $0x10] sm:$0xff]  ;;  %v289_v4 = vld [vmem:[#allocation5 + $0x18] sm:$0xff]  ;;  %v295_v7 = vld [vmem:[#allocation5 + $0x20] sm:$0xff]  ;;  %v261_v15 = vmov 0   ;;  %v262_v16 = vmov 0.0  }
   0x7   :  { %33 = vst.msk [vmem:[#allocation2 + $0x8] sm:$0xff] %vm31_vm0, %v260_v0  ;;  %v73_v5 = vmax.f32 %v283_v1, %v287_v3  ;;  %v74_v6 = vmax.f32 %v285_v2, %v289_v4  ;;  %v297_v8 = vld [vmem:[#allocation5 + $0x28] sm:$0xff]  ;;  %v299_v9 = vld [vmem:[#allocation5 + $0x30] sm:$0xff]  ;;  %v301_v10 = vld [vmem:[#allocation5 + $0x38] sm:$0xff]  ;;  %204 = vset.pattern.permute.xlu1 %v261_v15  ;;  %205 = vset.pattern.permute.xlu2 %v261_v15  ;;  %v49_v28 = vand.u32 127, %v48_v27 }
   0x8   :  { %v78_v12 = vmax.f32 %v295_v7, %v299_v9  ;;  %v79_v13 = vmax.f32 %v297_v8, %v301_v10  ;;  %206 = vset.pattern.permute.xlu0 %v261_v15  ;;  %34 = vst.msk [vmem:[#allocation3] sm:$0xff] %vm31_vm0, %v262_v16  ;;  %v314_v17 = vld [vmem:[%s380_s1] sm:$0xff]  ;;  %v320_v18 = vld [vmem:[%s380_s1 + $0x8] sm:$0xff] }
   0x9   :  { %v75_v11 = vmax.f32 %v73_v5, %v74_v6  ;;  %35 = vst.msk [vmem:[#allocation3 + $0x8] sm:$0xff] %vm31_vm0, %v262_v16  ;;  %58 = vperm.xlu2 %205, %v314_v17   ;;  %v50_v29 = vadd.s32 128, %v49_v28  ;;  %v51_v31 = vadd.s32 256, %v49_v28  ;;  %v52_v32 = vadd.s32 384, %v49_v28 }
   0xa   :  { %v80_v14 = vmax.f32 %v78_v12, %v79_v13  ;;  %36 = vst.msk [vmem:[#allocation4] sm:$0xff] %vm31_vm0, %v262_v16  ;;  %vm187_vm9 = vcmp.eq.s32.totalorder %v314_v17, 4294967295  ;;  %vm188_vm10 = vcmp.eq.s32.totalorder %v320_v18, 4294967295 }
   0xb   :  { %76 = vmax.xlane.f32.xlu0 %v75_v11  ;;  %37 = vst.msk [vmem:[#allocation4 + $0x8] sm:$0xff] %vm31_vm0, %v262_v16 }
   0xd   :  { %v323_v19 = vld [vmem:[#allocation2] sm:$0xff] }
   0xe   :  { %v333_v23 = vld [vmem:[#allocation2 + $0x8] sm:$0xff] }
  0x11   :  { %61 = vperm.xlu2 %205, %v320_v18   ;;  %v146_v27 = vld [vmem:[#allocation4] sm:$0xff] }
  0x13   :  { %81 = vmax.xlane.f32.xlu0 %v80_v14 }
  0x63   :  { %v59_v30 = vpop.permute.xlu2 %58 }
  0x64   :  { %vm63_vm1 = vcmp.eq.s32.totalorder %v49_v28, %v59_v30  ;;  %vm64_vm2 = vcmp.eq.s32.totalorder %v50_v29, %v59_v30  ;;  %vm65_vm3 = vcmp.eq.s32.totalorder %v51_v31, %v59_v30  ;;  %vm66_vm4 = vcmp.eq.s32.totalorder %v52_v32, %v59_v30  ;;  %v125_v30 = vld [vmem:[#allocation3] sm:$0xff] }
  0x65   :  { %v148_v33 = vsel %vm63_vm1, %v283_v1, 0.0  ;;  %v149_v34 = vsel %vm64_vm2, %v285_v2, 0.0  ;;  %v150_v36 = vsel %vm65_vm3, %v287_v3, 0.0  ;;  %v151_v37 = vsel %vm66_vm4, %v289_v4, 0.0 }
  0x66   :  { %v156_v35 = vadd.f32 %v149_v34, %v148_v33 }
  0x68   :  { %v157_v38 = vadd.f32 %v156_v35, %v150_v36  ;;  %v126_v35 = vld [vmem:[#allocation3 + $0x8] sm:$0xff]  ;;  %v147_v36 = vld [vmem:[#allocation4 + $0x8] sm:$0xff] }
  0x6a   :  { %v158_v39 = vadd.f32 %v157_v38, %v151_v37 }
  0x6b   :  { %v62_v48 = vpop.permute.xlu2 %61 }
  0x6c   :  { %159 = vadd.xlane.f32.xlu2 %v158_v39  ;;  %vm67_vm5 = vcmp.eq.s32.totalorder %v49_v28, %v62_v48  ;;  %vm68_vm6 = vcmp.eq.s32.totalorder %v50_v29, %v62_v48  ;;  %vm69_vm7 = vcmp.eq.s32.totalorder %v51_v31, %v62_v48  ;;  %vm70_vm8 = vcmp.eq.s32.totalorder %v52_v32, %v62_v48 }
  0x6d   :  { %v152_v60 = vsel %vm67_vm5, %v295_v7, 0.0  ;;  %v153_v61 = vsel %vm68_vm6, %v297_v8, 0.0 }
  0x7e   :  { %v77_v20 = vpop.xlane.xlu0 %76 }
  0x7f   :  { %v326_v21 = vmax.f32 %v323_v19, %v77_v20 }
  0x81   :  { %v119_v22 = vsub.f32 %v323_v19, %v326_v21  ;;  %144 = vst.msk [vmem:[#allocation2] sm:$0xff] %vm31_vm0, %v326_v21  ;;  %87 = vperm.xlu1 %204, %v326_v21  }
  0x83   :  { %v121_v28 = vmul.f32 1.442695, %v119_v22 }
  0x86   :  { %v82_v24 = vpop.xlane.xlu0 %81 }
  0x87   :  { %v336_v25 = vmax.f32 %v333_v23, %v82_v24 }
  0x89   :  { %v120_v26 = vsub.f32 %v333_v23, %v336_v25  ;;  %145 = vst.msk [vmem:[#allocation2 + $0x8] sm:$0xff] %vm31_vm0, %v336_v25  ;;  %92 = vperm.xlu1 %204, %v336_v25  }
  0xdf   :  { %v160_v24 = vpop.xlane.xlu2 %159 }
  0xf3   :  { %v88_v40 = vpop.permute.xlu1 %87 }
  0xf4   :  { %v95_v41 = vsub.f32 %v283_v1, %v88_v40  ;;  %v96_v42 = vsub.f32 %v285_v2, %v88_v40  ;;  %v97_v43 = vsub.f32 %v287_v3, %v88_v40  ;;  %v98_v44 = vsub.f32 %v289_v4, %v88_v40 }
  0xf5   :  { %v161_v2 = vadd.f32 %v153_v61, %v152_v60  ;;  %v154_v4 = vsel %vm69_vm7, %v299_v9, 0.0 }
  0xf6   :  { %v103_v45 = vmul.f32 1.442695, %v95_v41  ;;  %v105_v46 = vmul.f32 1.442695, %v96_v42  ;;  %v107_v47 = vmul.f32 1.442695, %v97_v43 }
  0xf7   :  { %v109_v49 = vmul.f32 1.442695, %v98_v44 }
  0xf8   :  { %207 = vpow2.f32 %v103_v45 }
  0xf9   :  { %209 = vpow2.f32 %v105_v46 }
  0xfa   :  { %211 = vpow2.f32 %v107_v47  ;;  %v174_v47 = vld [vmem:[#allocation2 + $0x8] sm:$0xff] }
  0xfb   :  { %v93_v50 = vpop.permute.xlu1 %92  ;;  %213 = vpow2.f32 %v109_v49 }
  0xfc   :  { %v99_v51 = vsub.f32 %v295_v7, %v93_v50  ;;  %v100_v52 = vsub.f32 %v297_v8, %v93_v50  ;;  %v101_v53 = vsub.f32 %v299_v9, %v93_v50  ;;  %v102_v54 = vsub.f32 %v301_v10, %v93_v50 }
  0xfd   :  { %v162_v7 = vadd.f32 %v161_v2, %v154_v4  ;;  %v155_v8 = vsel %vm70_vm8, %v301_v10, 0.0  ;;  %v166_v9 = vadd.f32 %v160_v24, %v146_v27  ;;  %v123_v10 = vmul.f32 1.442695, %v120_v26  ;;  %v173_v26 = vld [vmem:[#allocation2] sm:$0xff] }
  0xfe   :  { %v208_v55 = vpop.eup %207  ;;  %v111_v56 = vmul.f32 1.442695, %v99_v51  ;;  %v113_v57 = vmul.f32 1.442695, %v100_v52  ;;  %v115_v59 = vmul.f32 1.442695, %v101_v53 }
  0xff   :  { %v210_v58 = vpop.eup %209  ;;  %v117_v0 = vmul.f32 1.442695, %v102_v54  ;;  %v163_v14 = vadd.f32 %v162_v7, %v155_v8  ;;  %168 = vst.msk [vmem:[#allocation4] sm:$0xff] %vm31_vm0, %v166_v9 }
 0x100   :  { %215 = vpow2.f32 %v111_v56  ;;  %v129_v62 = vadd.f32 %v210_v58, %v208_v55  ;;  %v212_v63 = vpop.eup %211 }
 0x101   :  { %217 = vpow2.f32 %v113_v57  ;;  %v214_v3 = vpop.eup %213 }
 0x102   :  { %v130_v1 = vadd.f32 %v212_v63, %v129_v62  ;;  %219 = vpow2.f32 %v115_v59 }
 0x103   :  { %221 = vpow2.f32 %v117_v0 }
 0x104   :  { %v131_v5 = vadd.f32 %v214_v3, %v130_v1  ;;  %223 = vpow2.f32 %v121_v28 }
 0x105   :  { %225 = vpow2.f32 %v123_v10 }
 0x106   :  { %v216_v6 = vpop.eup %215  ;;  %132 = vadd.xlane.f32.xlu0 %v131_v5  ;;  %v183_v42 = vld [vmem:[#allocation4] sm:$0xff] }
 0x107   :  { %v218_v11 = vpop.eup %217 }
 0x108   :  { %v134_v12 = vadd.f32 %v218_v11, %v216_v6  ;;  %v220_v13 = vpop.eup %219 }
 0x109   :  { %v222_v16 = vpop.eup %221 }
 0x10a   :  { %v135_v15 = vadd.f32 %v220_v13, %v134_v12  ;;  %v224_v29 = vpop.eup %223 }
 0x10b   :  { %v127_v31 = vmul.f32 %v224_v29, %v125_v30  ;;  %v226_v34 = vpop.eup %225 }
 0x10c   :  { %v136_v20 = vadd.f32 %v222_v16, %v135_v15  ;;  %v128_v37 = vmul.f32 %v226_v34, %v126_v35 }
 0x10e   :  { %164 = vadd.xlane.f32.xlu0 %v163_v14  ;;  %137 = vadd.xlane.f32.xlu1 %v136_v20 }
 0x179   :  { %v133_v32 = vpop.xlane.xlu0 %132 }
 0x17a   :  { %v139_v33 = vadd.f32 %v133_v32, %v127_v31 }
 0x17c   :  { %142 = vst.msk [vmem:[#allocation3] sm:$0xff] %vm31_vm0, %v139_v33 }
 0x181   :  { %v165_v38 = vpop.xlane.xlu0 %164  ;;  %v138_v19 = vpop.xlane.xlu1 %137 }
 0x182   :  { %v167_v21 = vadd.f32 %v165_v38, %v147_v36  ;;  %v140_v22 = vadd.f32 %v138_v19, %v128_v37 }
 0x183   :  { %v175_v39 = vld [vmem:[#allocation3] sm:$0xff] }
 0x184   :  { %227 = vlog2.f32 %v175_v39  ;;  %169 = vst.msk [vmem:[#allocation4 + $0x8] sm:$0xff] %vm31_vm0, %v167_v21 }
 0x185   :  { %143 = vst.msk [vmem:[#allocation3 + $0x8] sm:$0xff] %vm31_vm0, %v140_v22 }
 0x18a   :  { %v228_v23 = vpop.eup %227 }
 0x18b   :  { %v178_v25 = vmul.f32 0.6931472, %v228_v23  ;;  %v184_v49 = vld [vmem:[#allocation4 + $0x8] sm:$0xff] }
 0x18c   :  { %v176_v40 = vld [vmem:[#allocation3 + $0x8] sm:$0xff] }
 0x18d   :  { %v181_v41 = vadd.f32 %v178_v25, %v173_v26  ;;  %229 = vlog2.f32 %v176_v40 }
 0x18f   :  { %v185_v43 = vsub.f32 %v181_v41, %v183_v42 }
 0x191   :  { %v189_v44 = vsel %vm187_vm9, 0.0, %v185_v43 }
 0x192   :  { %191 = vst.msk [vmem:[%s381_s2] sm:$0xff] %vm31_vm0, %v189_v44 }
 0x193   :  { %v230_v45 = vpop.eup %229 }
 0x194   :  { %v180_v46 = vmul.f32 0.6931472, %v230_v45 }
 0x196   :  { %v182_v48 = vadd.f32 %v180_v46, %v174_v47 }
 0x198   :  { %v186_v50 = vsub.f32 %v182_v48, %v184_v49 }
 0x19a   :  { %v190_v51 = vsel %vm188_vm10, 0.0, %v186_v50 }
 0x19b   :  { %192 = vst.msk [vmem:[%s381_s2 + $0x8] sm:$0xff] %vm31_vm0, %v190_v51 }
 0x19c   :  { %197 = vsyncpa [#allocation6], 1 }

</bundles_post_ra>
